<compile_context>
chip_gen: v7x
topology: tpu7x:2x2x1
jax: 0.10.0
libtpu: 0.0.40
codegen_flags: <defaults>
</compile_context>

<pallas_src>
import math
import numpy as np
import jax
import jax.numpy as jnp
from jax import lax
from jax.experimental import pallas as pl
from jax.experimental.pallas import tpu as pltpu

# ---------------- small synthetic shapes ----------------
B = 2                      # batch
C_IMG = 3                  # image channels (CLIP expects RGB)
H = W = 16                 # spatial size of image / audio spectrogram
UP = 7                     # nn.Upsample(scale_factor=7), nearest
POOL = 256 // 32           # nn.AvgPool2d(kernel_size=8), stride=8
HO = (H * UP) // POOL      # 14
WO = (W * UP) // POOL      # 14
C_AUD_OUT = 3              # AudioEncoder: Conv2d(1, 3, (3, 3))
KH = KW = 3
HCA = H - KH + 1           # 14
WCA = W - KW + 1           # 14
FEAT = 512                 # CLIP / resnet18 feature dim
FLAT_IMG = C_IMG * HO * WO        # 588
FLAT_AUD = C_AUD_OUT * HCA * WCA  # 588
IMG_IN = C_IMG * H * W            # 768 (flattened image)
AUD_IN = H * W                    # 256 (flattened single-channel audio)
LOGIT_SCALE = math.exp(0.07)
EPS = 1e-12


# ---------------- fused Pallas kernel ----------------
def _fused_kernel(img_ref, aud_ref, wimg_ref, waud_ref, baud_ref,
                  audn_ref, loss_ref):
    # image branch (upsample+avgpool+projection folded): bf16 MXU matmul, f32 acc
    img_f = jnp.dot(img_ref[...].astype(jnp.bfloat16), wimg_ref[...],
                    preferred_element_type=jnp.float32)                 # (B, 512)
    # audio branch (conv+projection folded): bf16 MXU matmul + f32 bias
    aud_f = jnp.dot(aud_ref[...].astype(jnp.bfloat16), waud_ref[...],
                    preferred_element_type=jnp.float32) + baud_ref[...]  # (B, 512)

    # L2-normalise with rsqrt (EUP slot, eps guards divide-by-zero)
    img_n = img_f * lax.rsqrt(jnp.sum(img_f * img_f, axis=-1, keepdims=True) + EPS)
    aud_n = aud_f * lax.rsqrt(jnp.sum(aud_f * aud_f, axis=-1, keepdims=True) + EPS)

    audn_ref[...] = aud_n                                                # lane-dense (B, 512)

    # only row 0 of the similarity matrix is needed: (1, FEAT) . (B, FEAT)^T
    sim_row = lax.dot_general(img_n[0:1, :], aud_n, (((1,), (1,)), ((), ())),
                              preferred_element_type=jnp.float32)        # (1, B)
    loss_ref[...] = 1.0 - sim_row * LOGIT_SCALE


def _vmem():
    return pl.BlockSpec(memory_space=pltpu.MemorySpace.VMEM)


# ---------------- parameter folding (done once, in numpy) ----------------
def _resample_matrix():
    # pooled[oh, ow] = mean_{a,b in [0,8)} in[(oh*8+a)//7, (ow*8+b)//7]
    # returned as R: (HO*WO, H*W) with pooled_flat = R @ in_flat
    row_cnt = np.zeros((HO, H), np.float32)
    for oh in range(HO):
        for a in range(POOL):
            row_cnt[oh, (oh * POOL + a) // UP] += 1.0
    col_cnt = np.zeros((WO, W), np.float32)
    for ow in range(WO):
        for b in range(POOL):
            col_cnt[ow, (ow * POOL + b) // UP] += 1.0
    R = np.einsum('oi,pj->opij', row_cnt, col_cnt).reshape(HO * WO, H * W)
    return R / float(POOL * POOL)


def _conv_matrix(conv_w):
    # Conv2d(1, 3, (3,3)), valid padding, stride 1, as a (H*W, C*HCA*WCA) matrix
    M = np.zeros((H * W, C_AUD_OUT * HCA * WCA), np.float32)
    cw = np.asarray(conv_w)[:, 0]                     # (C, KH, KW)
    for c in range(C_AUD_OUT):
        for i in range(HCA):
            for j in range(WCA):
                col = c * HCA * WCA + i * WCA + j
                for ki in range(KH):
                    for kj in range(KW):
                        M[(i + ki) * W + (j + kj), col] += cw[c, ki, kj]
    return M


def fold_params(conv_w, conv_b, w_img, w_aud):
    # image: pooled_flat[b, c*196+p] = sum_q R[p, q] * image[b, c*256+q]
    #   => W_img_c[c*256+q, f] = sum_p R[p, q] * w_img[c*196+p, f]
    R = _resample_matrix()                                        # (196, 256)
    w_img_np = np.asarray(w_img).reshape(C_IMG, HO * WO, FEAT)
    w_img_c = np.einsum('pq,cpf->cqf', R, w_img_np).reshape(IMG_IN, FEAT)

    # audio: conv_flat = audio_flat @ M + b_flat  =>  fold into w_aud
    M = _conv_matrix(conv_w)                                      # (256, 588)
    w_aud_np = np.asarray(w_aud)                                  # (588, 512)
    w_aud_c = M @ w_aud_np                                        # (256, 512)
    b_flat = np.repeat(np.asarray(conv_b), HCA * WCA)             # (588,)
    b_aud = (b_flat @ w_aud_np).reshape(1, FEAT)                  # (1, 512)

    return dict(
        w_img_c=jnp.asarray(w_img_c, jnp.bfloat16),   # bf16 weights, f32 accumulation
        w_aud_c=jnp.asarray(w_aud_c, jnp.bfloat16),
        b_aud=jnp.asarray(b_aud, jnp.float32),
    )


# ---------------- wrapper ----------------
def soundclip_loss(image, audio, params):
    Bn = image.shape[0]
    img_flat = image.reshape(Bn, IMG_IN).astype(jnp.float32)      # (B, 768)
    aud_flat = audio.reshape(Bn, AUD_IN).astype(jnp.float32)      # (B, 256)

    cost = pl.CostEstimate(
        flops=2 * Bn * FEAT * (IMG_IN + AUD_IN) + 2 * Bn * FEAT,
        transcendentals=2 * Bn,
        bytes_accessed=(IMG_IN + AUD_IN) * FEAT * 2               # bf16 weights
                       + Bn * (IMG_IN + AUD_IN) * 4               # inputs
                       + FEAT * 4                                 # bias
                       + (Bn * FEAT + Bn) * 4)                    # outputs

    aud_n, loss2d = pl.pallas_call(
        _fused_kernel,
        out_shape=(jax.ShapeDtypeStruct((Bn, FEAT), jnp.float32),
                   jax.ShapeDtypeStruct((1, Bn), jnp.float32)),
        in_specs=[_vmem(), _vmem(), _vmem(), _vmem(), _vmem()],
        out_specs=(_vmem(), _vmem()),
        cost_estimate=cost,
    )(img_flat, aud_flat, params['w_img_c'], params['w_aud_c'], params['b_aud'])

    return aud_n, loss2d[0]          # (B, 512), (B,)


# ---------------- pure-JAX f32 reference (original, un-folded pipeline) ----------------
def reference(image, audio, conv_w, conv_b, w_img, w_aud):
    up = jnp.repeat(jnp.repeat(image, UP, axis=2), UP, axis=3)
    pooled = up.reshape(B, C_IMG, HO, POOL, WO, POOL).mean(axis=(3, 5))
    img_f = pooled.reshape(B, FLAT_IMG) @ w_img
    a = audio[:, 0]
    outs = []
    for c in range(C_AUD_OUT):
        acc = jnp.zeros((B, HCA, WCA), jnp.float32) + conv_b[c]
        for ki in range(KH):
            for kj in range(KW):
                acc = acc + conv_w[c, 0, ki, kj] * a[:, ki:ki + HCA, kj:kj + WCA]
        outs.append(acc)
    conv = jnp.stack(outs, axis=1)
    aud_f = conv.reshape(B, FLAT_AUD) @ w_aud
    aud_n = aud_f / jnp.linalg.norm(aud_f, axis=-1, keepdims=True)
    img_n = img_f / jnp.linalg.norm(img_f, axis=-1, keepdims=True)
    sim = (img_n @ aud_n.T)[0] * LOGIT_SCALE
    return aud_n, 1.0 - sim


if __name__ == "__main__":
    key = jax.random.PRNGKey(0)
    kc, kb, ki, ka, kx, ky = jax.random.split(key, 6)

    # Conv2d(1, 3, (3, 3)) params (deterministic synthetic init)
    conv_w = jax.random.normal(kc, (C_AUD_OUT, 1, KH, KW), jnp.float32) * 0.1
    conv_b = jax.random.normal(kb, (C_AUD_OUT,), jnp.float32) * 0.1
    # stand-in projection weights for CLIP image tower / resnet18 audio tower
    w_img = jax.random.normal(ki, (FLAT_IMG, FEAT), jnp.float32) / jnp.sqrt(float(FLAT_IMG))
    w_aud = jax.random.normal(ka, (FLAT_AUD, FEAT), jnp.float32) / jnp.sqrt(float(FLAT_AUD))

    params = fold_params(conv_w, conv_b, w_img, w_aud)

    image = jax.random.normal(kx, (B, C_IMG, H, W), jnp.float32)
    audio = jax.random.normal(ky, (B, 1, H, W), jnp.float32)

    aud_feat, loss = soundclip_loss(image, audio, params)
    aud_feat = jax.block_until_ready(aud_feat)
    loss = jax.block_until_ready(loss)

    # tolerance accounts for bf16 weight storage (f32 accumulation on MXU)
    ref_feat, ref_loss = reference(image, audio, conv_w, conv_b, w_img, w_aud)
    assert bool(jnp.allclose(aud_feat, ref_feat, atol=2e-2, rtol=2e-2))
    assert bool(jnp.allclose(loss, ref_loss, atol=2e-2, rtol=2e-2))

    print("KERNEL_OK")
</pallas_src>

<mosaic_0001>
module attributes {stable_mosaic.version = 11 : i64} {
  func.func @_fused_kernel(%arg0: memref<2x768xf32, #tpu.memory_space<vmem>>, %arg1: memref<2x256xf32, #tpu.memory_space<vmem>>, %arg2: memref<768x512xbf16, #tpu.memory_space<vmem>>, %arg3: memref<256x512xbf16, #tpu.memory_space<vmem>>, %arg4: memref<1x512xf32, #tpu.memory_space<vmem>>, %arg5: memref<2x512xf32, #tpu.memory_space<vmem>>, %arg6: memref<1x2xf32, #tpu.memory_space<vmem>>) attributes {dimension_semantics = [], scalar_prefetch = 0 : i64, scratch_operands = 0 : i64, tpu.core_type = #tpu.core_type<tc>} {
    %c0 = arith.constant 0 : index
    %c0_0 = arith.constant 0 : index
    %0 = vector.load %arg0[%c0, %c0_0] : memref<2x768xf32, #tpu.memory_space<vmem>>, vector<2x768xf32>
    %1 = arith.truncf %0 : vector<2x768xf32> to vector<2x768xbf16>
    %c0_1 = arith.constant 0 : index
    %c0_2 = arith.constant 0 : index
    %2 = vector.load %arg2[%c0_1, %c0_2] : memref<768x512xbf16, #tpu.memory_space<vmem>>, vector<768x512xbf16>
    %cst = arith.constant dense<0.000000e+00> : vector<2x512xf32>
    %3 = tpu.matmul %1, %2, %cst {dimension_numbers = #tpu.dot_dimension_numbers<[1], [0], [0], [1], [0, 0, 1, 1], [], []>} : vector<2x768xbf16>, vector<768x512xbf16>, vector<2x512xf32> -> vector<2x512xf32>
    %c0_3 = arith.constant 0 : index
    %c0_4 = arith.constant 0 : index
    %4 = vector.load %arg1[%c0_3, %c0_4] : memref<2x256xf32, #tpu.memory_space<vmem>>, vector<2x256xf32>
    %5 = arith.truncf %4 : vector<2x256xf32> to vector<2x256xbf16>
    %c0_5 = arith.constant 0 : index
    %c0_6 = arith.constant 0 : index
    %6 = vector.load %arg3[%c0_5, %c0_6] : memref<256x512xbf16, #tpu.memory_space<vmem>>, vector<256x512xbf16>
    %cst_7 = arith.constant dense<0.000000e+00> : vector<2x512xf32>
    %7 = tpu.matmul %5, %6, %cst_7 {dimension_numbers = #tpu.dot_dimension_numbers<[1], [0], [0], [1], [0, 0, 1, 1], [], []>} : vector<2x256xbf16>, vector<256x512xbf16>, vector<2x512xf32> -> vector<2x512xf32>
    %c0_8 = arith.constant 0 : index
    %c0_9 = arith.constant 0 : index
    %8 = vector.load %arg4[%c0_8, %c0_9] : memref<1x512xf32, #tpu.memory_space<vmem>>, vector<1x512xf32>
    %9 = vector.broadcast %8 : vector<1x512xf32> to vector<2x512xf32>
    %10 = arith.addf %7, %9 : vector<2x512xf32>
    %11 = arith.mulf %3, %3 : vector<2x512xf32>
    %cst_10 = arith.constant dense<0.000000e+00> : vector<2xf32>
    %12 = vector.multi_reduction <add>, %11, %cst_10 [1] : vector<2x512xf32> to vector<2xf32>
    %13 = vector.shape_cast %12 : vector<2xf32> to vector<2x1xf32>
    %cst_11 = arith.constant 9.99999996E-13 : f32
    %14 = vector.broadcast %cst_11 : f32 to vector<2x1xf32>
    %15 = arith.addf %13, %14 : vector<2x1xf32>
    %16 = math.rsqrt %15 : vector<2x1xf32>
    %17 = vector.broadcast %16 : vector<2x1xf32> to vector<2x512xf32>
    %18 = arith.mulf %3, %17 : vector<2x512xf32>
    %19 = arith.mulf %10, %10 : vector<2x512xf32>
    %cst_12 = arith.constant dense<0.000000e+00> : vector<2xf32>
    %20 = vector.multi_reduction <add>, %19, %cst_12 [1] : vector<2x512xf32> to vector<2xf32>
    %21 = vector.shape_cast %20 : vector<2xf32> to vector<2x1xf32>
    %cst_13 = arith.constant 9.99999996E-13 : f32
    %22 = vector.broadcast %cst_13 : f32 to vector<2x1xf32>
    %23 = arith.addf %21, %22 : vector<2x1xf32>
    %24 = math.rsqrt %23 : vector<2x1xf32>
    %25 = vector.broadcast %24 : vector<2x1xf32> to vector<2x512xf32>
    %26 = arith.mulf %10, %25 : vector<2x512xf32>
    %c0_14 = arith.constant 0 : index
    %c0_15 = arith.constant 0 : index
    %27 = vector.load %arg5[%c0_14, %c0_15] : memref<2x512xf32, #tpu.memory_space<vmem>>, vector<2x512xf32>
    tpu.vector_store %arg5[%c0_14, %c0_15], %26 {strides = array<i32>} : memref<2x512xf32, #tpu.memory_space<vmem>>, vector<2x512xf32>,
    %28 = vector.extract_strided_slice %18 {offsets = [0, 0], sizes = [1, 512], strides = [1, 1]} : vector<2x512xf32> to vector<1x512xf32>
    %cst_16 = arith.constant dense<0.000000e+00> : vector<1x2xf32>
    %29 = tpu.matmul %28, %26, %cst_16 {dimension_numbers = #tpu.dot_dimension_numbers<[1], [1], [0], [0], [0, 0, 1, 0], [], []>} : vector<1x512xf32>, vector<2x512xf32>, vector<1x2xf32> -> vector<1x2xf32>
    %cst_17 = arith.constant 1.07250822 : f32
    %30 = vector.broadcast %cst_17 : f32 to vector<1x2xf32>
    %31 = arith.mulf %29, %30 : vector<1x2xf32>
    %cst_18 = arith.constant 1.000000e+00 : f32
    %32 = vector.broadcast %cst_18 : f32 to vector<1x2xf32>
    %33 = arith.subf %32, %31 : vector<1x2xf32>
    %c0_19 = arith.constant 0 : index
    %c0_20 = arith.constant 0 : index
    %34 = vector.load %arg6[%c0_19, %c0_20] : memref<1x2xf32, #tpu.memory_space<vmem>>, vector<1x2xf32>
    tpu.vector_store %arg6[%c0_19, %c0_20], %33 {strides = array<i32>} : memref<1x2xf32, #tpu.memory_space<vmem>>, vector<1x2xf32>,
    return
  }
}

</mosaic_0001>

<bundles_post_ra>
// kernel: tpu_custom_call.1
= control target key start
LH: loop header
LB: loop body
LE: loop exit
PB: predicated region body
PF: predicated region fallthrough
CT: control target
= control target key end

     0   :  { %12 = vsyncpa [#allocation3], 0  ;;  %s3246_s0 = inlined_call_operand.hbm [shape: f32[2,768], index: 0, kind: input, shape index: {}]   ;;  %s3247_s1 = inlined_call_operand.hbm [shape: f32[2,256], index: 1, kind: input, shape index: {}]   ;;  %s3248_s2 = inlined_call_operand.hbm [shape: bf16[768,512], index: 2, kind: input, shape index: {}]   ;;  %s3249_s3 = inlined_call_operand.hbm [shape: bf16[256,512], index: 3, kind: input, shape index: {}]   ;;  %s3250_s4 = inlined_call_operand.vmem [shape: f32[1,512], index: 4, kind: input, shape index: {}]   ;;  %s3251_s5 = inlined_call_operand.hbm [shape: f32[2,512], index: 5, kind: output, shape index: {0}]   ;;  %s3252_s6 = inlined_call_operand.hbm [shape: f32[1,2], index: 6, kind: output, shape index: {1}]  }
   0x1   :  { %13 = vsyncpa [#allocation6], 0 }
   0x2   :  { %14 = vsyncpa [#allocation9], 0 }
   0x3   :  { %15 = vsyncpa [#allocation4], 0 }
   0x4   :  { %16 = vsyncpa [#allocation12], 0  ;;  %s3068_s21 = smov [#allocation5]   ;;  %s3069_s23 = smov [#allocation2]  }
   0x5   :  { %s33_s22 = sshll.u32 %s3068_s21, 4  ;;  %s23_s24 = sshll.u32 %s3069_s23, 4  ;;  %s34_s22 = int_to_ptr.vmem [resolvable:$true] %s33_s22  ;;  %s24_s24 = int_to_ptr.vmem [resolvable:$true] %s23_s24 }
   0x6   :  { %s2926_s27 = scalar_lea.hbm %s3247_s1, 64 }
   0x7   :  { %p2927_p0 = scmp.ne.s32.totalorder %s3247_s1, %s2926_s27  ;;  %p2930_p1 = scmp.lt.u32.totalorder %s2926_s27, %s3247_s1 }
   0x9   :  { %p2932_p2 = pnand %p2930_p1, %p2927_p0 }
   0xb   :  { %2935 = shalt.err (!%p2932_p2)
}
   0xc   :  { %s2936_s8 = scalar_lea.vmem %s34_s22, 64  ;;  %p2941_p4 = scmp.lt.s32.totalorder %s34_s22, %s34_s22 }
   0xd   :  { %p2937_p3 = scmp.ne.s32.totalorder %s34_s22, %s2936_s8  ;;  %p2942_p5 = scmp.lt.s32.totalorder %s2936_s8, %s2936_s8 }
   0xf   :  { %p2943_p6 = por %p2942_p5, %p2941_p4 }
  0x11   :  { %p2944_p7 = pnand %p2943_p6, %p2937_p3 }
  0x13   :  { %2947 = shalt.err (!%p2944_p7)
}
  0x14   :  { %36 = dma.hbm_to_vmem [thread:$0]  %s3247_s1, 64, %s34_s22, [#allocation6]  }
  0x15   :  { %s2948_s13 = scalar_lea.hbm %s3246_s0, 192 }
  0x16   :  { %p2949_p8 = scmp.ne.s32.totalorder %s3246_s0, %s2948_s13  ;;  %p2952_p9 = scmp.lt.u32.totalorder %s2948_s13, %s3246_s0 }
  0x18   :  { %p2954_p10 = pnand %p2952_p9, %p2949_p8 }
  0x1a   :  { %2957 = shalt.err (!%p2954_p10)
}
  0x1b   :  { %s2958_s18 = scalar_lea.vmem %s24_s24, 192  ;;  %p2963_p12 = scmp.lt.s32.totalorder %s24_s24, %s24_s24 }
  0x1c   :  { %p2959_p11 = scmp.ne.s32.totalorder %s24_s24, %s2958_s18  ;;  %p2964_p13 = scmp.lt.s32.totalorder %s2958_s18, %s2958_s18 }
  0x1e   :  { %p2965_p0 = por %p2964_p13, %p2963_p12 }
  0x20   :  { %p2966_p1 = pnand %p2965_p0, %p2959_p11 }
  0x22   :  { %2969 = shalt.err (!%p2966_p1)
}
  0x23   :  { %26 = dma.hbm_to_vmem [thread:$0]  %s3246_s0, 192, %s24_s24, [#allocation3]  }
  0x24   :  { %s3070_s20 = smov [#allocation7]   ;;  %s2970_s25 = scalar_lea.hbm %s3248_s2, 24576 }
  0x25   :  { %s42_s21 = sshll.u32 %s3070_s20, 4  ;;  %p2971_p2 = scmp.ne.s32.totalorder %s3248_s2, %s2970_s25  ;;  %s43_s21 = int_to_ptr.vmem [resolvable:$true] %s42_s21 }
  0x26   :  { %p2974_p3 = scmp.lt.u32.totalorder %s2970_s25, %s3248_s2 }
  0x28   :  { %p2976_p4 = pnand %p2974_p3, %p2971_p2 }
  0x2a   :  { %2979 = shalt.err (!%p2976_p4)
}
  0x2b   :  { %s2980_s30 = scalar_lea.vmem %s43_s21, 24576  ;;  %p2985_p6 = scmp.lt.s32.totalorder %s43_s21, %s43_s21 }
  0x2c   :  { %p2981_p5 = scmp.ne.s32.totalorder %s43_s21, %s2980_s30  ;;  %p2986_p7 = scmp.lt.s32.totalorder %s2980_s30, %s2980_s30 }
  0x2e   :  { %p2987_p8 = por %p2986_p7, %p2985_p6 }
  0x30   :  { %p2988_p9 = pnand %p2987_p8, %p2981_p5 }
  0x32   :  { %2991 = shalt.err (!%p2988_p9)
}
  0x33   :  { %s3071_s0 = smov 256   ;;  %s3072_s24 = smov 16  }
  0x34   :  { %48 = dma.hbm_to_vmem [thread:$0]  %s3248_s2, 24576, %s43_s21, [#allocation6], %s3071_s0, %s3071_s0, %s3072_s24  }
  0x35   :  { %s3073_s9 = smov [#allocation8]   ;;  %s2992_s13 = scalar_lea.hbm %s3249_s3, 8192 }
  0x36   :  { %s54_s10 = sshll.u32 %s3073_s9, 4  ;;  %p2993_p10 = scmp.ne.s32.totalorder %s3249_s3, %s2992_s13  ;;  %s55_s10 = int_to_ptr.vmem [resolvable:$true] %s54_s10 }
  0x37   :  { %p2996_p11 = scmp.lt.u32.totalorder %s2992_s13, %s3249_s3 }
  0x39   :  { %p2998_p12 = pnand %p2996_p11, %p2993_p10 }
  0x3b   :  { %3001 = shalt.err (!%p2998_p12)
}
  0x3c   :  { %s3002_s18 = scalar_lea.vmem %s55_s10, 8192  ;;  %p3007_p0 = scmp.lt.s32.totalorder %s55_s10, %s55_s10 }
  0x3d   :  { %p3003_p13 = scmp.ne.s32.totalorder %s55_s10, %s3002_s18  ;;  %p3008_p1 = scmp.lt.s32.totalorder %s3002_s18, %s3002_s18 }
  0x3f   :  { %p3009_p2 = por %p3008_p1, %p3007_p0 }
  0x41   :  { %p3010_p3 = pnand %p3009_p2, %p3003_p13 }
  0x43   :  { %3013 = shalt.err (!%p3010_p3)
}
  0x44   :  { %60 = dma.hbm_to_vmem [thread:$0]  %s3249_s3, 8192, %s55_s10, [#allocation9], %s3071_s0, %s3071_s0, %s3072_s24  }
  0x45   :  { %3058 = dma.done.wait [#allocation3], 192  }
  0x46   :  { %3059 = vsyncadd [#allocation3], 4294967104 }
  0x47   :  { %3060 = dma.done.wait [#allocation6], 24640  }
  0x48   :  { %3061 = vsyncadd [#allocation6], 4294942656 }
  0x49   :  { %3062 = dma.done.wait [#allocation9], 8192  }
  0x4a   :  { %3063 = vsyncadd [#allocation9], 4294959104  ;;  %v2537_v0 = vld [vmem:[#allocation7 + $0x4] ss:$16 sps:$4 sm:$0xff]   ;;  %v2539_v1 = vld [vmem:[#allocation7 + $0xc] ss:$16 sps:$4 sm:$0xff]   ;;  %v83_v38 = vlaneseq }
  0x4b   :  { %1268 = vmatprep.subr.bf16.mxu0 %v2537_v0  ;;  %v2541_v2 = vld [vmem:[#allocation7] ss:$16 sps:$4 sm:$0xff]   ;;  %v2542_v3 = vld [vmem:[#allocation7 + $0x8] ss:$16 sps:$4 sm:$0xff]   ;;  %1391 = vmatprep.subr.bf16.mxu1 %v2539_v1  ;;  %v2543_v4 = vld [vmem:[#allocation7 + $0x24] ss:$16 sps:$4 sm:$0xff]  }
  0x4c   :  { %1269 = vmatpush1.bf16.msra.mxu0 %v2541_v2  ;;  %1392 = vmatpush1.bf16.msra.mxu1 %v2542_v3  ;;  %v2545_v5 = vld [vmem:[#allocation7 + $0x2c] ss:$16 sps:$4 sm:$0xff]   ;;  %v2547_v6 = vld [vmem:[#allocation7 + $0x20] ss:$16 sps:$4 sm:$0xff]   ;;  %v2548_v7 = vld [vmem:[#allocation7 + $0x28] ss:$16 sps:$4 sm:$0xff]  }
  0x4d   :  { %1270 = vmatprep.subr.bf16.mxu0 %v2543_v4  ;;  %1393 = vmatprep.subr.bf16.mxu1 %v2545_v5  ;;  %v2549_v8 = vld [vmem:[#allocation7 + $0x44] ss:$16 sps:$4 sm:$0xff]   ;;  %v2551_v9 = vld [vmem:[#allocation7 + $0x4c] ss:$16 sps:$4 sm:$0xff]   ;;  %v2553_v10 = vld [vmem:[#allocation7 + $0x40] ss:$16 sps:$4 sm:$0xff]  }
  0x4e   :  { %v2554_v11 = vld [vmem:[#allocation7 + $0x48] ss:$16 sps:$4 sm:$0xff]   ;;  %v2555_v12 = vld [vmem:[#allocation7 + $0x64] ss:$16 sps:$4 sm:$0xff]   ;;  %v2557_v13 = vld [vmem:[#allocation7 + $0x6c] ss:$16 sps:$4 sm:$0xff]  }
  0x4f   :  { %v2559_v14 = vld [vmem:[#allocation7 + $0x60] ss:$16 sps:$4 sm:$0xff]   ;;  %v2560_v15 = vld [vmem:[#allocation7 + $0x68] ss:$16 sps:$4 sm:$0xff]   ;;  %v2561_v16 = vld [vmem:[#allocation7 + $0x84] ss:$16 sps:$4 sm:$0xff]  }
  0x50   :  { %1271 = vmatpush1.bf16.msra.mxu0 %v2547_v6  ;;  %1394 = vmatpush1.bf16.msra.mxu1 %v2548_v7  ;;  %v2563_v17 = vld [vmem:[#allocation7 + $0x8c] ss:$16 sps:$4 sm:$0xff]   ;;  %v2565_v18 = vld [vmem:[#allocation7 + $0x80] ss:$16 sps:$4 sm:$0xff]   ;;  %v2566_v19 = vld [vmem:[#allocation7 + $0x88] ss:$16 sps:$4 sm:$0xff]  }
  0x51   :  { %1272 = vmatprep.subr.bf16.mxu0 %v2549_v8  ;;  %1395 = vmatprep.subr.bf16.mxu1 %v2551_v9  ;;  %v2567_v20 = vld [vmem:[#allocation7 + $0xa4] ss:$16 sps:$4 sm:$0xff]   ;;  %v2569_v21 = vld [vmem:[#allocation7 + $0xac] ss:$16 sps:$4 sm:$0xff]   ;;  %v2571_v22 = vld [vmem:[#allocation7 + $0xa0] ss:$16 sps:$4 sm:$0xff]  }
  0x52   :  { %v2572_v23 = vld [vmem:[#allocation7 + $0xa8] ss:$16 sps:$4 sm:$0xff]   ;;  %v2573_v24 = vld [vmem:[#allocation7 + $0xc4] ss:$16 sps:$4 sm:$0xff]   ;;  %v2575_v25 = vld [vmem:[#allocation7 + $0xcc] ss:$16 sps:$4 sm:$0xff]  }
  0x53   :  { %v2577_v26 = vld [vmem:[#allocation7 + $0xc0] ss:$16 sps:$4 sm:$0xff]   ;;  %v2578_v27 = vld [vmem:[#allocation7 + $0xc8] ss:$16 sps:$4 sm:$0xff]   ;;  %v2579_v28 = vld [vmem:[#allocation7 + $0xe4] ss:$16 sps:$4 sm:$0xff]  }
  0x54   :  { %1273 = vmatpush1.bf16.msra.mxu0 %v2553_v10  ;;  %1396 = vmatpush1.bf16.msra.mxu1 %v2554_v11  ;;  %v2581_v29 = vld [vmem:[#allocation7 + $0xec] ss:$16 sps:$4 sm:$0xff]   ;;  %v2583_v30 = vld [vmem:[#allocation7 + $0xe0] ss:$16 sps:$4 sm:$0xff]   ;;  %v2584_v31 = vld [vmem:[#allocation7 + $0xe8] ss:$16 sps:$4 sm:$0xff]  }
  0x55   :  { %1274 = vmatprep.subr.bf16.mxu0 %v2555_v12  ;;  %1397 = vmatprep.subr.bf16.mxu1 %v2557_v13  ;;  %v2585_v32 = vld [vmem:[#allocation7 + $0x104] ss:$16 sps:$4 sm:$0xff]   ;;  %v2587_v33 = vld [vmem:[#allocation7 + $0x10c] ss:$16 sps:$4 sm:$0xff]   ;;  %v2589_v34 = vld [vmem:[#allocation7 + $0x100] ss:$16 sps:$4 sm:$0xff]  }
  0x56   :  { %v2590_v35 = vld [vmem:[#allocation7 + $0x108] ss:$16 sps:$4 sm:$0xff]   ;;  %v3074_v36 = vmov 1983009808   ;;  %v2591_v39 = vld [vmem:[#allocation7 + $0x124] ss:$16 sps:$4 sm:$0xff]  }
  0x57   :  { %v81_v37 = vunpack.c.l.s4 %v3074_v36  ;;  %v2593_v40 = vld [vmem:[#allocation7 + $0x12c] ss:$16 sps:$4 sm:$0xff]   ;;  %v2595_v41 = vld [vmem:[#allocation7 + $0x120] ss:$16 sps:$4 sm:$0xff]   ;;  %v3160_v43 = vshrl.u32 %v83_v38, 7  ;;  %vm2020_vm0 = vcmask 1041408  }
  0x58   :  { %1275 = vmatpush1.bf16.msra.mxu0 %v2559_v14  ;;  %1398 = vmatpush1.bf16.msra.mxu1 %v2560_v15  ;;  %v2596_v44 = vld [vmem:[#allocation7 + $0x128] ss:$16 sps:$4 sm:$0xff]   ;;  %v2597_v45 = vld [vmem:[#allocation7 + $0x144] ss:$16 sps:$4 sm:$0xff]   ;;  %v2599_v46 = vld [vmem:[#allocation7 + $0x14c] ss:$16 sps:$4 sm:$0xff]  }
  0x59   :  { %1276 = vmatprep.subr.bf16.mxu0 %v2561_v16  ;;  %1399 = vmatprep.subr.bf16.mxu1 %v2563_v17  ;;  %v82_v42 = vunpack.c.0.s8 %v81_v37  ;;  %v2601_v47 = vld [vmem:[#allocation7 + $0x140] ss:$16 sps:$4 sm:$0xff]   ;;  %v2602_v48 = vld [vmem:[#allocation7 + $0x148] ss:$16 sps:$4 sm:$0xff]   ;;  %v2603_v50 = vld [vmem:[#allocation7 + $0x164] ss:$16 sps:$4 sm:$0xff]  }
  0x5a   :  { %v2605_v51 = vld [vmem:[#allocation7 + $0x16c] ss:$16 sps:$4 sm:$0xff]   ;;  %v75_v52 = vld [vmem:[#allocation2] sm:$0xff]  ;;  %v2608_v55 = vld [vmem:[#allocation7 + $0x168] ss:$16 sps:$4 sm:$0xff]  }
  0x5b   :  { %v3163_v49 = vsub.s32 %v82_v42, %v3160_v43  ;;  %v2607_v53 = vld [vmem:[#allocation7 + $0x160] ss:$16 sps:$4 sm:$0xff]   ;;  %v2609_v56 = vld [vmem:[#allocation7 + $0x184] ss:$16 sps:$4 sm:$0xff]   ;;  %v2611_v57 = vld [vmem:[#allocation7 + $0x18c] ss:$16 sps:$4 sm:$0xff]   ;;  %v79_v4 = vcombine.high %v75_v52, %v75_v52 }
  0x5c   :  { %1277 = vmatpush1.bf16.msra.mxu0 %v2565_v18  ;;  %1400 = vmatpush1.bf16.msra.mxu1 %v2566_v19  ;;  %v2613_v59 = vld [vmem:[#allocation7 + $0x180] ss:$16 sps:$4 sm:$0xff]   ;;  %v2614_v61 = vld [vmem:[#allocation7 + $0x188] ss:$16 sps:$4 sm:$0xff]   ;;  %v2615_v62 = vld [vmem:[#allocation7 + $0x1a4] ss:$16 sps:$4 sm:$0xff]  }
  0x5d   :  { %1278 = vmatprep.subr.bf16.mxu0 %v2567_v20  ;;  %1401 = vmatprep.subr.bf16.mxu1 %v2569_v21  ;;  %v86_v54 = vrot.slane %v75_v52, %v3163_v49  ;;  %v2617_v63 = vld [vmem:[#allocation7 + $0x1ac] ss:$16 sps:$4 sm:$0xff]   ;;  %v2619_v0 = vld [vmem:[#allocation7 + $0x1a0] ss:$16 sps:$4 sm:$0xff]   ;;  %v2620_v1 = vld [vmem:[#allocation7 + $0x1a8] ss:$16 sps:$4 sm:$0xff]   ;;  %v3167_v9 = vrot.slane %v79_v4, %v3163_v49 }
  0x5e   :  { %v2621_v2 = vld [vmem:[#allocation7 + $0x1c4] ss:$16 sps:$4 sm:$0xff]   ;;  %v2623_v3 = vld [vmem:[#allocation7 + $0x1cc] ss:$16 sps:$4 sm:$0xff]   ;;  %v2625_v5 = vld [vmem:[#allocation7 + $0x1c0] ss:$16 sps:$4 sm:$0xff]  }
  0x5f   :  { %v94_v58 = vcombine.high %v86_v54, %v86_v54  ;;  %v2626_v6 = vld [vmem:[#allocation7 + $0x1c8] ss:$16 sps:$4 sm:$0xff]   ;;  %v2627_v7 = vld [vmem:[#allocation7 + $0x1e4] ss:$16 sps:$4 sm:$0xff]   ;;  %v2629_v8 = vld [vmem:[#allocation7 + $0x1ec] ss:$16 sps:$4 sm:$0xff]   ;;  %v95_v14 = vcombine.high %v3167_v9, %v3167_v9  ;;  %v110_v16 = vpack.c.bf16 %v86_v54, %v86_v54 }
  0x60   :  { %1279 = vmatpush1.bf16.msra.mxu0 %v2571_v22  ;;  %1402 = vmatpush1.bf16.msra.mxu1 %v2572_v23  ;;  %v2631_v10 = vld [vmem:[#allocation7 + $0x1e0] ss:$16 sps:$4 sm:$0xff]   ;;  %v2632_v11 = vld [vmem:[#allocation7 + $0x1e8] ss:$16 sps:$4 sm:$0xff]   ;;  %v2636_v12 = vld [vmem:[#allocation7 + $0x204] ss:$16 sps:$4 sm:$0xff]  }
  0x61   :  { %1280 = vmatprep.subr.bf16.mxu0 %v2573_v24  ;;  %1403 = vmatprep.subr.bf16.mxu1 %v2575_v25  ;;  %v111_v60 = vpack.c.bf16 %v94_v58, %v94_v58  ;;  %v2639_v13 = vld [vmem:[#allocation7 + $0x20c] ss:$16 sps:$4 sm:$0xff]   ;;  %v2634_v15 = vld [vmem:[#allocation7 + $0x200] ss:$16 sps:$4 sm:$0xff]   ;;  %v2637_v17 = vld [vmem:[#allocation7 + $0x208] ss:$16 sps:$4 sm:$0xff]   ;;  %v113_v20 = vpack.c.bf16 %v95_v14, %v95_v14 }
  0x62   :  { %v2642_v18 = vld [vmem:[#allocation7 + $0x224] ss:$16 sps:$4 sm:$0xff]   ;;  %v2645_v19 = vld [vmem:[#allocation7 + $0x22c] ss:$16 sps:$4 sm:$0xff]   ;;  %v2640_v21 = vld [vmem:[#allocation7 + $0x220] ss:$16 sps:$4 sm:$0xff]  }
  0x63   :  { %1300 = vmatprep.mubr.bf16.mxu0 %v111_v60  ;;  %1423 = vmatprep.mubr.bf16.mxu1 %v111_v60  ;;  %v2643_v22 = vld [vmem:[#allocation7 + $0x228] ss:$16 sps:$4 sm:$0xff]   ;;  %v2648_v23 = vld [vmem:[#allocation7 + $0x244] ss:$16 sps:$4 sm:$0xff]   ;;  %v2651_v24 = vld [vmem:[#allocation7 + $0x24c] ss:$16 sps:$4 sm:$0xff]  }
  0x64   :  { %1281 = vmatpush1.bf16.msra.mxu0 %v2577_v26  ;;  %1404 = vmatpush1.bf16.msra.mxu1 %v2578_v27  ;;  %v2646_v25 = vld [vmem:[#allocation7 + $0x240] ss:$16 sps:$4 sm:$0xff]   ;;  %v2649_v26 = vld [vmem:[#allocation7 + $0x248] ss:$16 sps:$4 sm:$0xff]   ;;  %v2654_v27 = vld [vmem:[#allocation7 + $0x264] ss:$16 sps:$4 sm:$0xff]  }
  0x65   :  { %1282 = vmatprep.subr.bf16.mxu0 %v2579_v28  ;;  %1405 = vmatprep.subr.bf16.mxu1 %v2581_v29  ;;  %v2657_v28 = vld [vmem:[#allocation7 + $0x26c] ss:$16 sps:$4 sm:$0xff]   ;;  %v2652_v29 = vld [vmem:[#allocation7 + $0x260] ss:$16 sps:$4 sm:$0xff]   ;;  %v2667_v38 = vld [vmem:[#allocation7 + $0x2a8] ss:$16 sps:$4 sm:$0xff]  }
  0x66   :  { %v2669_v36 = vld [vmem:[#allocation7 + $0x2ac] ss:$16 sps:$4 sm:$0xff]   ;;  %v2664_v37 = vld [vmem:[#allocation7 + $0x2a0] ss:$16 sps:$4 sm:$0xff]   ;;  %v2673_v42 = vld [vmem:[#allocation7 + $0x2c8] ss:$16 sps:$4 sm:$0xff]  }
  0x67   :  { %v2685_v52 = vld [vmem:[#allocation7 + $0x308] ss:$16 sps:$4 sm:$0xff]   ;;  %v2693_v54 = vld [vmem:[#allocation7 + $0x32c] ss:$16 sps:$4 sm:$0xff]   ;;  %v2726_v14 = vld [vmem:[#allocation7 + $0x3e4] ss:$16 sps:$4 sm:$0xff]  }
  0x68   :  { %1283 = vmatpush1.bf16.msra.mxu0 %v2583_v30  ;;  %1406 = vmatpush1.bf16.msra.mxu1 %v2584_v31  ;;  %v2655_v30 = vld [vmem:[#allocation7 + $0x268] ss:$16 sps:$4 sm:$0xff]   ;;  %v2660_v31 = vld [vmem:[#allocation7 + $0x284] ss:$16 sps:$4 sm:$0xff]   ;;  %v2699_v58 = vld [vmem:[#allocation7 + $0x34c] ss:$16 sps:$4 sm:$0xff]  }
  0x69   :  { %1284 = vmatprep.subr.bf16.mxu0 %v2585_v32  ;;  %1407 = vmatprep.subr.bf16.mxu1 %v2587_v33  ;;  %v2663_v32 = vld [vmem:[#allocation7 + $0x28c] ss:$16 sps:$4 sm:$0xff]   ;;  %v2658_v33 = vld [vmem:[#allocation7 + $0x280] ss:$16 sps:$4 sm:$0xff]   ;;  %v2697_v60 = vld [vmem:[#allocation7 + $0x348] ss:$16 sps:$4 sm:$0xff]  }
  0x6a   :  { %v2709_v4 = vld [vmem:[#allocation7 + $0x388] ss:$16 sps:$4 sm:$0xff]  }
  0x6c   :  { %1285 = vmatpush1.bf16.msra.mxu0 %v2589_v34  ;;  %1408 = vmatpush1.bf16.msra.mxu1 %v2590_v35  ;;  %v2661_v34 = vld [vmem:[#allocation7 + $0x288] ss:$16 sps:$4 sm:$0xff]   ;;  %v2666_v35 = vld [vmem:[#allocation7 + $0x2a4] ss:$16 sps:$4 sm:$0xff]  }
  0x6d   :  { %1286 = vmatprep.subr.bf16.mxu0 %v2591_v39  ;;  %1409 = vmatprep.subr.bf16.mxu1 %v2593_v40  ;;  %v2672_v39 = vld [vmem:[#allocation7 + $0x2c4] ss:$16 sps:$4 sm:$0xff]   ;;  %v2675_v40 = vld [vmem:[#allocation7 + $0x2cc] ss:$16 sps:$4 sm:$0xff]  }
  0x70   :  { %1287 = vmatpush1.bf16.msra.mxu0 %v2595_v41  ;;  %1410 = vmatpush1.bf16.msra.mxu1 %v2596_v44  ;;  %v2670_v41 = vld [vmem:[#allocation7 + $0x2c0] ss:$16 sps:$4 sm:$0xff]   ;;  %v2678_v44 = vld [vmem:[#allocation7 + $0x2e4] ss:$16 sps:$4 sm:$0xff]  }
  0x71   :  { %1288 = vmatprep.subr.bf16.mxu0 %v2597_v45  ;;  %1411 = vmatprep.subr.bf16.mxu1 %v2599_v46  ;;  %v2681_v45 = vld [vmem:[#allocation7 + $0x2ec] ss:$16 sps:$4 sm:$0xff]   ;;  %v2676_v46 = vld [vmem:[#allocation7 + $0x2e0] ss:$16 sps:$4 sm:$0xff]  }
  0x74   :  { %1289 = vmatpush1.bf16.msra.mxu0 %v2601_v47  ;;  %1412 = vmatpush1.bf16.msra.mxu1 %v2602_v48  ;;  %v2679_v47 = vld [vmem:[#allocation7 + $0x2e8] ss:$16 sps:$4 sm:$0xff]   ;;  %v2684_v48 = vld [vmem:[#allocation7 + $0x304] ss:$16 sps:$4 sm:$0xff]  }
  0x75   :  { %1290 = vmatprep.subr.bf16.mxu0 %v2603_v50  ;;  %1413 = vmatprep.subr.bf16.mxu1 %v2605_v51  ;;  %v2687_v50 = vld [vmem:[#allocation7 + $0x30c] ss:$16 sps:$4 sm:$0xff]   ;;  %v2682_v51 = vld [vmem:[#allocation7 + $0x300] ss:$16 sps:$4 sm:$0xff]  }
  0x78   :  { %1291 = vmatpush1.bf16.msra.mxu0 %v2607_v53  ;;  %1414 = vmatpush1.bf16.msra.mxu1 %v2608_v55  ;;  %v2690_v53 = vld [vmem:[#allocation7 + $0x324] ss:$16 sps:$4 sm:$0xff]   ;;  %v2688_v55 = vld [vmem:[#allocation7 + $0x320] ss:$16 sps:$4 sm:$0xff]  }
  0x79   :  { %1292 = vmatprep.subr.bf16.mxu0 %v2609_v56  ;;  %1415 = vmatprep.subr.bf16.mxu1 %v2611_v57  ;;  %v2691_v56 = vld [vmem:[#allocation7 + $0x328] ss:$16 sps:$4 sm:$0xff]   ;;  %v2696_v57 = vld [vmem:[#allocation7 + $0x344] ss:$16 sps:$4 sm:$0xff]  }
  0x7c   :  { %1293 = vmatpush1.bf16.msra.mxu0 %v2613_v59  ;;  %1416 = vmatpush1.bf16.msra.mxu1 %v2614_v61  ;;  %v2694_v59 = vld [vmem:[#allocation7 + $0x340] ss:$16 sps:$4 sm:$0xff]   ;;  %v2702_v61 = vld [vmem:[#allocation7 + $0x364] ss:$16 sps:$4 sm:$0xff]  }
  0x7d   :  { %1294 = vmatprep.subr.bf16.mxu0 %v2615_v62  ;;  %1417 = vmatprep.subr.bf16.mxu1 %v2617_v63  ;;  %v2705_v62 = vld [vmem:[#allocation7 + $0x36c] ss:$16 sps:$4 sm:$0xff]   ;;  %v2700_v63 = vld [vmem:[#allocation7 + $0x360] ss:$16 sps:$4 sm:$0xff]  }
  0x80   :  { %1295 = vmatpush1.bf16.msra.mxu0 %v2619_v0  ;;  %1418 = vmatpush1.bf16.msra.mxu1 %v2620_v1  ;;  %v2703_v0 = vld [vmem:[#allocation7 + $0x368] ss:$16 sps:$4 sm:$0xff]   ;;  %v2708_v1 = vld [vmem:[#allocation7 + $0x384] ss:$16 sps:$4 sm:$0xff]  }
  0x81   :  { %1296 = vmatprep.subr.bf16.mxu0 %v2621_v2  ;;  %1419 = vmatprep.subr.bf16.mxu1 %v2623_v3  ;;  %v2711_v2 = vld [vmem:[#allocation7 + $0x38c] ss:$16 sps:$4 sm:$0xff]   ;;  %v2706_v3 = vld [vmem:[#allocation7 + $0x380] ss:$16 sps:$4 sm:$0xff]  }
  0x84   :  { %1297 = vmatpush1.bf16.msra.mxu0 %v2625_v5  ;;  %1420 = vmatpush1.bf16.msra.mxu1 %v2626_v6  ;;  %v2714_v5 = vld [vmem:[#allocation7 + $0x3a4] ss:$16 sps:$4 sm:$0xff]   ;;  %v2717_v6 = vld [vmem:[#allocation7 + $0x3ac] ss:$16 sps:$4 sm:$0xff]  }
  0x85   :  { %1298 = vmatprep.subr.bf16.mxu0 %v2627_v7  ;;  %1421 = vmatprep.subr.bf16.mxu1 %v2629_v8  ;;  %v2712_v7 = vld [vmem:[#allocation7 + $0x3a0] ss:$16 sps:$4 sm:$0xff]   ;;  %v2715_v8 = vld [vmem:[#allocation7 + $0x3a8] ss:$16 sps:$4 sm:$0xff]  }
  0x88   :  { %1299 = vmatpush1.bf16.msra.mxu0 %v2631_v10  ;;  %1422 = vmatpush1.bf16.msra.mxu1 %v2632_v11  ;;  %v2720_v10 = vld [vmem:[#allocation7 + $0x3c4] ss:$16 sps:$4 sm:$0xff]   ;;  %v2723_v11 = vld [vmem:[#allocation7 + $0x3cc] ss:$16 sps:$4 sm:$0xff]  }
  0x89   :  { %1309 = vmatprep.subr.bf16.mxu0 %v2636_v12  ;;  %1432 = vmatprep.subr.bf16.mxu1 %v2639_v13  ;;  %v2718_v12 = vld [vmem:[#allocation7 + $0x3c0] ss:$16 sps:$4 sm:$0xff]   ;;  %v2721_v13 = vld [vmem:[#allocation7 + $0x3c8] ss:$16 sps:$4 sm:$0xff]  }
  0x8b   :  { %1301 = vmatmul.mubr.bf16.vlgmr.msra.gmra.mrb[0].mxu0 %v110_v16  ;;  %1424 = vmatmul.mubr.bf16.vlgmr.msra.gmra.mrb[0].mxu1 %v110_v16  ;;  %v2724_v16 = vld [vmem:[#allocation7 + $0x3e0] ss:$16 sps:$4 sm:$0xff]  }
  0x8c   :  { %1310 = vmatpush1.bf16.msra.mxu0 %v2634_v15  ;;  %1433 = vmatpush1.bf16.msra.mxu1 %v2637_v17  ;;  %v2729_v15 = vld [vmem:[#allocation7 + $0x3ec] ss:$16 sps:$4 sm:$0xff]   ;;  %v2727_v17 = vld [vmem:[#allocation7 + $0x3e8] ss:$16 sps:$4 sm:$0xff]  }
  0x8d   :  { %1311 = vmatprep.subr.bf16.mxu0 %v2642_v18  ;;  %1434 = vmatprep.subr.bf16.mxu1 %v2645_v19  ;;  %v2732_v18 = vld [vmem:[#allocation7 + $0x404] ss:$16 sps:$4 sm:$0xff]   ;;  %v2735_v19 = vld [vmem:[#allocation7 + $0x40c] ss:$16 sps:$4 sm:$0xff]  }
  0x8e   :  { %1341 = vmatprep.mubr.bf16.mxu0 %v113_v20  ;;  %1464 = vmatprep.mubr.bf16.mxu1 %v113_v20  ;;  %v2730_v20 = vld [vmem:[#allocation7 + $0x400] ss:$16 sps:$4 sm:$0xff]  }
  0x90   :  { %1312 = vmatpush1.bf16.msra.mxu0 %v2640_v21  ;;  %1435 = vmatpush1.bf16.msra.mxu1 %v2643_v22  ;;  %v2733_v21 = vld [vmem:[#allocation7 + $0x408] ss:$16 sps:$4 sm:$0xff]   ;;  %v112_v22 = vpack.c.bf16 %v3167_v9, %v3167_v9  ;;  %v2747_v9 = vld [vmem:[#allocation7 + $0x44c] ss:$16 sps:$4 sm:$0xff]  }
  0x91   :  { %1313 = vmatprep.subr.bf16.mxu0 %v2648_v23  ;;  %1436 = vmatprep.subr.bf16.mxu1 %v2651_v24  ;;  %v2738_v23 = vld [vmem:[#allocation7 + $0x424] ss:$16 sps:$4 sm:$0xff]   ;;  %v3173_v24 = vld.sshfl [vmem:[#allocation2 + $0x8] sm:$0x33 pattern:$0x76325410] }
  0x94   :  { %1314 = vmatpush1.bf16.msra.mxu0 %v2646_v25  ;;  %1437 = vmatpush1.bf16.msra.mxu1 %v2649_v26  ;;  %v2741_v25 = vld [vmem:[#allocation7 + $0x42c] ss:$16 sps:$4 sm:$0xff]   ;;  %v103_v26 = vcombine.high %v3173_v24, %v3173_v24 }
  0x95   :  { %1315 = vmatprep.subr.bf16.mxu0 %v2654_v27  ;;  %1438 = vmatprep.subr.bf16.mxu1 %v2657_v28  ;;  %v2736_v27 = vld [vmem:[#allocation7 + $0x420] ss:$16 sps:$4 sm:$0xff]  }
  0x96   :  { %v115_v28 = vpack.c.bf16 %v103_v26, %v103_v26  ;;  %v2828_v26 = vld [vmem:[#allocation8 + $0x4] ss:$16 sps:$4 sm:$0xff]  }
  0x98   :  { %1316 = vmatpush1.bf16.msra.mxu0 %v2652_v29  ;;  %1439 = vmatpush1.bf16.msra.mxu1 %v2655_v30  ;;  %v2739_v29 = vld [vmem:[#allocation7 + $0x428] ss:$16 sps:$4 sm:$0xff]   ;;  %v2744_v30 = vld [vmem:[#allocation7 + $0x444] ss:$16 sps:$4 sm:$0xff]  }
  0x99   :  { %1317 = vmatprep.subr.bf16.mxu0 %v2660_v31  ;;  %1440 = vmatprep.subr.bf16.mxu1 %v2663_v32  ;;  %v2742_v31 = vld [vmem:[#allocation7 + $0x440] ss:$16 sps:$4 sm:$0xff]   ;;  %v2745_v32 = vld [vmem:[#allocation7 + $0x448] ss:$16 sps:$4 sm:$0xff]  }
  0x9c   :  { %1318 = vmatpush1.bf16.msra.mxu0 %v2658_v33  ;;  %1441 = vmatpush1.bf16.msra.mxu1 %v2661_v34  ;;  %v2750_v33 = vld [vmem:[#allocation7 + $0x464] ss:$16 sps:$4 sm:$0xff]   ;;  %v2753_v34 = vld [vmem:[#allocation7 + $0x46c] ss:$16 sps:$4 sm:$0xff]  }
  0x9d   :  { %1319 = vmatprep.subr.bf16.mxu0 %v2666_v35  ;;  %1442 = vmatprep.subr.bf16.mxu1 %v2669_v36  ;;  %v2748_v35 = vld [vmem:[#allocation7 + $0x460] ss:$16 sps:$4 sm:$0xff]   ;;  %v2751_v36 = vld [vmem:[#allocation7 + $0x468] ss:$16 sps:$4 sm:$0xff]  }
  0xa0   :  { %1320 = vmatpush1.bf16.msra.mxu0 %v2664_v37  ;;  %1443 = vmatpush1.bf16.msra.mxu1 %v2667_v38  ;;  %v2756_v37 = vld [vmem:[#allocation7 + $0x484] ss:$16 sps:$4 sm:$0xff]   ;;  %v2759_v38 = vld [vmem:[#allocation7 + $0x48c] ss:$16 sps:$4 sm:$0xff]  }
  0xa1   :  { %1321 = vmatprep.subr.bf16.mxu0 %v2672_v39  ;;  %1444 = vmatprep.subr.bf16.mxu1 %v2675_v40  ;;  %v2754_v39 = vld [vmem:[#allocation7 + $0x480] ss:$16 sps:$4 sm:$0xff]   ;;  %v2757_v40 = vld [vmem:[#allocation7 + $0x488] ss:$16 sps:$4 sm:$0xff]  }
  0xa4   :  { %1322 = vmatpush1.bf16.msra.mxu0 %v2670_v41  ;;  %1445 = vmatpush1.bf16.msra.mxu1 %v2673_v42  ;;  %v2762_v41 = vld [vmem:[#allocation7 + $0x4a4] ss:$16 sps:$4 sm:$0xff]   ;;  %v2765_v42 = vld [vmem:[#allocation7 + $0x4ac] ss:$16 sps:$4 sm:$0xff]  }
  0xa5   :  { %1323 = vmatprep.subr.bf16.mxu0 %v2678_v44  ;;  %1446 = vmatprep.subr.bf16.mxu1 %v2681_v45  ;;  %v2760_v44 = vld [vmem:[#allocation7 + $0x4a0] ss:$16 sps:$4 sm:$0xff]   ;;  %v2763_v45 = vld [vmem:[#allocation7 + $0x4a8] ss:$16 sps:$4 sm:$0xff]  }
  0xa8   :  { %1324 = vmatpush1.bf16.msra.mxu0 %v2676_v46  ;;  %1447 = vmatpush1.bf16.msra.mxu1 %v2679_v47  ;;  %v2768_v46 = vld [vmem:[#allocation7 + $0x4c4] ss:$16 sps:$4 sm:$0xff]   ;;  %v2771_v47 = vld [vmem:[#allocation7 + $0x4cc] ss:$16 sps:$4 sm:$0xff]  }
  0xa9   :  { %1325 = vmatprep.subr.bf16.mxu0 %v2684_v48  ;;  %1448 = vmatprep.subr.bf16.mxu1 %v2687_v50  ;;  %v2766_v48 = vld [vmem:[#allocation7 + $0x4c0] ss:$16 sps:$4 sm:$0xff]   ;;  %v2769_v50 = vld [vmem:[#allocation7 + $0x4c8] ss:$16 sps:$4 sm:$0xff]  }
  0xac   :  { %1326 = vmatpush1.bf16.msra.mxu0 %v2682_v51  ;;  %1449 = vmatpush1.bf16.msra.mxu1 %v2685_v52  ;;  %v2774_v51 = vld [vmem:[#allocation7 + $0x4e4] ss:$16 sps:$4 sm:$0xff]   ;;  %v2777_v52 = vld [vmem:[#allocation7 + $0x4ec] ss:$16 sps:$4 sm:$0xff]  }
  0xad   :  { %1327 = vmatprep.subr.bf16.mxu0 %v2690_v53  ;;  %1450 = vmatprep.subr.bf16.mxu1 %v2693_v54  ;;  %v2772_v53 = vld [vmem:[#allocation7 + $0x4e0] ss:$16 sps:$4 sm:$0xff]   ;;  %v2775_v54 = vld [vmem:[#allocation7 + $0x4e8] ss:$16 sps:$4 sm:$0xff]  }
  0xb0   :  { %1328 = vmatpush1.bf16.msra.mxu0 %v2688_v55  ;;  %1451 = vmatpush1.bf16.msra.mxu1 %v2691_v56  ;;  %v2780_v55 = vld [vmem:[#allocation7 + $0x504] ss:$16 sps:$4 sm:$0xff]   ;;  %v2783_v56 = vld [vmem:[#allocation7 + $0x50c] ss:$16 sps:$4 sm:$0xff]  }
  0xb1   :  { %1329 = vmatprep.subr.bf16.mxu0 %v2696_v57  ;;  %1452 = vmatprep.subr.bf16.mxu1 %v2699_v58  ;;  %v2778_v57 = vld [vmem:[#allocation7 + $0x500] ss:$16 sps:$4 sm:$0xff]   ;;  %v2781_v58 = vld [vmem:[#allocation7 + $0x508] ss:$16 sps:$4 sm:$0xff]  }
  0xb4   :  { %1330 = vmatpush1.bf16.msra.mxu0 %v2694_v59  ;;  %1453 = vmatpush1.bf16.msra.mxu1 %v2697_v60  ;;  %v2786_v59 = vld [vmem:[#allocation7 + $0x524] ss:$16 sps:$4 sm:$0xff]   ;;  %v2789_v60 = vld [vmem:[#allocation7 + $0x52c] ss:$16 sps:$4 sm:$0xff]  }
  0xb5   :  { %1331 = vmatprep.subr.bf16.mxu0 %v2702_v61  ;;  %1454 = vmatprep.subr.bf16.mxu1 %v2705_v62  ;;  %v2784_v61 = vld [vmem:[#allocation7 + $0x520] ss:$16 sps:$4 sm:$0xff]   ;;  %v2787_v62 = vld [vmem:[#allocation7 + $0x528] ss:$16 sps:$4 sm:$0xff]  }
  0xb8   :  { %1332 = vmatpush1.bf16.msra.mxu0 %v2700_v63  ;;  %1455 = vmatpush1.bf16.msra.mxu1 %v2703_v0  ;;  %v2792_v63 = vld [vmem:[#allocation7 + $0x544] ss:$16 sps:$4 sm:$0xff]   ;;  %v2795_v0 = vld [vmem:[#allocation7 + $0x54c] ss:$16 sps:$4 sm:$0xff]  }
  0xb9   :  { %1333 = vmatprep.subr.bf16.mxu0 %v2708_v1  ;;  %1456 = vmatprep.subr.bf16.mxu1 %v2711_v2  ;;  %v2790_v1 = vld [vmem:[#allocation7 + $0x540] ss:$16 sps:$4 sm:$0xff]   ;;  %v2793_v2 = vld [vmem:[#allocation7 + $0x548] ss:$16 sps:$4 sm:$0xff]  }
  0xbc   :  { %1334 = vmatpush1.bf16.msra.mxu0 %v2706_v3  ;;  %1457 = vmatpush1.bf16.msra.mxu1 %v2709_v4  ;;  %v2798_v3 = vld [vmem:[#allocation7 + $0x564] ss:$16 sps:$4 sm:$0xff]   ;;  %v2801_v4 = vld [vmem:[#allocation7 + $0x56c] ss:$16 sps:$4 sm:$0xff]  }
  0xbd   :  { %1335 = vmatprep.subr.bf16.mxu0 %v2714_v5  ;;  %1458 = vmatprep.subr.bf16.mxu1 %v2717_v6  ;;  %v2796_v5 = vld [vmem:[#allocation7 + $0x560] ss:$16 sps:$4 sm:$0xff]   ;;  %v2799_v6 = vld [vmem:[#allocation7 + $0x568] ss:$16 sps:$4 sm:$0xff]  }
  0xc0   :  { %1336 = vmatpush1.bf16.msra.mxu0 %v2712_v7  ;;  %1459 = vmatpush1.bf16.msra.mxu1 %v2715_v8  ;;  %v2804_v7 = vld [vmem:[#allocation7 + $0x584] ss:$16 sps:$4 sm:$0xff]   ;;  %v2807_v8 = vld [vmem:[#allocation7 + $0x58c] ss:$16 sps:$4 sm:$0xff]  }
  0xc1   :  { %1337 = vmatprep.subr.bf16.mxu0 %v2720_v10  ;;  %1460 = vmatprep.subr.bf16.mxu1 %v2723_v11  ;;  %v2802_v10 = vld [vmem:[#allocation7 + $0x580] ss:$16 sps:$4 sm:$0xff]   ;;  %v2805_v11 = vld [vmem:[#allocation7 + $0x588] ss:$16 sps:$4 sm:$0xff]  }
  0xc4   :  { %1338 = vmatpush1.bf16.msra.mxu0 %v2718_v12  ;;  %1461 = vmatpush1.bf16.msra.mxu1 %v2721_v13  ;;  %v2810_v12 = vld [vmem:[#allocation7 + $0x5a4] ss:$16 sps:$4 sm:$0xff]   ;;  %v2813_v13 = vld [vmem:[#allocation7 + $0x5ac] ss:$16 sps:$4 sm:$0xff]  }
  0xc5   :  { %1339 = vmatprep.subr.bf16.mxu0 %v2726_v14  ;;  %1462 = vmatprep.subr.bf16.mxu1 %v2729_v15  ;;  %v2808_v14 = vld [vmem:[#allocation7 + $0x5a0] ss:$16 sps:$4 sm:$0xff]   ;;  %v2811_v15 = vld [vmem:[#allocation7 + $0x5a8] ss:$16 sps:$4 sm:$0xff]  }
  0xc8   :  { %1340 = vmatpush1.bf16.msra.mxu0 %v2724_v16  ;;  %1463 = vmatpush1.bf16.msra.mxu1 %v2727_v17  ;;  %v2816_v16 = vld [vmem:[#allocation7 + $0x5c4] ss:$16 sps:$4 sm:$0xff]   ;;  %v2819_v17 = vld [vmem:[#allocation7 + $0x5cc] ss:$16 sps:$4 sm:$0xff]  }
  0xc9   :  { %1350 = vmatprep.subr.bf16.mxu0 %v2732_v18  ;;  %1473 = vmatprep.subr.bf16.mxu1 %v2735_v19  ;;  %v2814_v18 = vld [vmem:[#allocation7 + $0x5c0] ss:$16 sps:$4 sm:$0xff]   ;;  %v2817_v19 = vld [vmem:[#allocation7 + $0x5c8] ss:$16 sps:$4 sm:$0xff]  }
  0xcb   :  { %1342 = vmatmul.mubr.bf16.vlgmr.msra.gmra.mrb[0].mxu0 %v112_v22  ;;  %1465 = vmatmul.mubr.bf16.vlgmr.msra.gmra.mrb[0].mxu1 %v112_v22  ;;  %v3177_v22 = vld.sshfl [vmem:[#allocation5] sm:$0x33 pattern:$0x76325410] }
  0xcc   :  { %1351 = vmatpush1.bf16.msra.mxu0 %v2730_v20  ;;  %1474 = vmatpush1.bf16.msra.mxu1 %v2733_v21  ;;  %v2822_v20 = vld [vmem:[#allocation7 + $0x5e4] ss:$16 sps:$4 sm:$0xff]   ;;  %v2825_v21 = vld [vmem:[#allocation7 + $0x5ec] ss:$16 sps:$4 sm:$0xff]  }
  0xcd   :  { %1352 = vmatprep.subr.bf16.mxu0 %v2738_v23  ;;  %1475 = vmatprep.subr.bf16.mxu1 %v2741_v25  ;;  %v2820_v23 = vld [vmem:[#allocation7 + $0x5e0] ss:$16 sps:$4 sm:$0xff]   ;;  %v2823_v25 = vld [vmem:[#allocation7 + $0x5e8] ss:$16 sps:$4 sm:$0xff]  }
  0xce   :  { %1382 = vmatprep.mubr.bf16.mxu0 %v115_v28  ;;  %1505 = vmatprep.mubr.bf16.mxu1 %v115_v28  ;;  %v1523_v28 = vcombine.high %v3177_v22, %v3177_v22 }
  0xd0   :  { %1353 = vmatpush1.bf16.msra.mxu0 %v2736_v27  ;;  %1476 = vmatpush1.bf16.msra.mxu1 %v2739_v29  ;;  %v2831_v27 = vld [vmem:[#allocation8 + $0xc] ss:$16 sps:$4 sm:$0xff]   ;;  %v114_v29 = vpack.c.bf16 %v3173_v24, %v3173_v24  ;;  %v2838_v24 = vld [vmem:[#allocation8 + $0x40] ss:$16 sps:$4 sm:$0xff]  }
  0xd1   :  { %1354 = vmatprep.subr.bf16.mxu0 %v2744_v30  ;;  %1477 = vmatprep.subr.bf16.mxu1 %v2747_v9  ;;  %v2826_v30 = vld [vmem:[#allocation8] ss:$16 sps:$4 sm:$0xff]   ;;  %v2829_v9 = vld [vmem:[#allocation8 + $0x8] ss:$16 sps:$4 sm:$0xff]  }
  0xd4   :  { %1355 = vmatpush1.bf16.msra.mxu0 %v2742_v31  ;;  %1478 = vmatpush1.bf16.msra.mxu1 %v2745_v32  ;;  %v2834_v31 = vld [vmem:[#allocation8 + $0x24] ss:$16 sps:$4 sm:$0xff]   ;;  %v2837_v32 = vld [vmem:[#allocation8 + $0x2c] ss:$16 sps:$4 sm:$0xff]  }
  0xd5   :  { %1356 = vmatprep.subr.bf16.mxu0 %v2750_v33  ;;  %1479 = vmatprep.subr.bf16.mxu1 %v2753_v34  ;;  %v1527_v33 = vpack.c.bf16 %v1523_v28, %v1523_v28  ;;  %v2832_v34 = vld [vmem:[#allocation8 + $0x20] ss:$16 sps:$4 sm:$0xff]   ;;  %v2918_v28 = vld [vmem:[#allocation8 + $0x1e4] ss:$16 sps:$4 sm:$0xff]  }
  0xd8   :  { %1357 = vmatpush1.bf16.msra.mxu0 %v2748_v35  ;;  %1480 = vmatpush1.bf16.msra.mxu1 %v2751_v36  ;;  %v2835_v35 = vld [vmem:[#allocation8 + $0x28] ss:$16 sps:$4 sm:$0xff]   ;;  %v2840_v36 = vld [vmem:[#allocation8 + $0x44] ss:$16 sps:$4 sm:$0xff]  }
  0xd9   :  { %1358 = vmatprep.subr.bf16.mxu0 %v2756_v37  ;;  %1481 = vmatprep.subr.bf16.mxu1 %v2759_v38  ;;  %v2843_v37 = vld [vmem:[#allocation8 + $0x4c] ss:$16 sps:$4 sm:$0xff]   ;;  %v2841_v38 = vld [vmem:[#allocation8 + $0x48] ss:$16 sps:$4 sm:$0xff]  }
  0xdc   :  { %1359 = vmatpush1.bf16.msra.mxu0 %v2754_v39  ;;  %1482 = vmatpush1.bf16.msra.mxu1 %v2757_v40  ;;  %v2846_v39 = vld [vmem:[#allocation8 + $0x64] ss:$16 sps:$4 sm:$0xff]   ;;  %v2849_v40 = vld [vmem:[#allocation8 + $0x6c] ss:$16 sps:$4 sm:$0xff]  }
  0xdd   :  { %1360 = vmatprep.subr.bf16.mxu0 %v2762_v41  ;;  %1483 = vmatprep.subr.bf16.mxu1 %v2765_v42  ;;  %v2844_v41 = vld [vmem:[#allocation8 + $0x60] ss:$16 sps:$4 sm:$0xff]   ;;  %v2847_v42 = vld [vmem:[#allocation8 + $0x68] ss:$16 sps:$4 sm:$0xff]  }
  0xe0   :  { %1361 = vmatpush1.bf16.msra.mxu0 %v2760_v44  ;;  %1484 = vmatpush1.bf16.msra.mxu1 %v2763_v45  ;;  %v2852_v44 = vld [vmem:[#allocation8 + $0x84] ss:$16 sps:$4 sm:$0xff]   ;;  %v2855_v45 = vld [vmem:[#allocation8 + $0x8c] ss:$16 sps:$4 sm:$0xff]  }
  0xe1   :  { %1362 = vmatprep.subr.bf16.mxu0 %v2768_v46  ;;  %1485 = vmatprep.subr.bf16.mxu1 %v2771_v47  ;;  %v2850_v46 = vld [vmem:[#allocation8 + $0x80] ss:$16 sps:$4 sm:$0xff]   ;;  %v2853_v47 = vld [vmem:[#allocation8 + $0x88] ss:$16 sps:$4 sm:$0xff]  }
  0xe4   :  { %1363 = vmatpush1.bf16.msra.mxu0 %v2766_v48  ;;  %1486 = vmatpush1.bf16.msra.mxu1 %v2769_v50  ;;  %v2858_v48 = vld [vmem:[#allocation8 + $0xa4] ss:$16 sps:$4 sm:$0xff]   ;;  %v2861_v50 = vld [vmem:[#allocation8 + $0xac] ss:$16 sps:$4 sm:$0xff]  }
  0xe5   :  { %1364 = vmatprep.subr.bf16.mxu0 %v2774_v51  ;;  %1487 = vmatprep.subr.bf16.mxu1 %v2777_v52  ;;  %v2856_v51 = vld [vmem:[#allocation8 + $0xa0] ss:$16 sps:$4 sm:$0xff]   ;;  %v2859_v52 = vld [vmem:[#allocation8 + $0xa8] ss:$16 sps:$4 sm:$0xff]  }
  0xe8   :  { %1365 = vmatpush1.bf16.msra.mxu0 %v2772_v53  ;;  %1488 = vmatpush1.bf16.msra.mxu1 %v2775_v54  ;;  %v2864_v53 = vld [vmem:[#allocation8 + $0xc4] ss:$16 sps:$4 sm:$0xff]   ;;  %v2867_v54 = vld [vmem:[#allocation8 + $0xcc] ss:$16 sps:$4 sm:$0xff]  }
  0xe9   :  { %1366 = vmatprep.subr.bf16.mxu0 %v2780_v55  ;;  %1489 = vmatprep.subr.bf16.mxu1 %v2783_v56  ;;  %v2862_v55 = vld [vmem:[#allocation8 + $0xc0] ss:$16 sps:$4 sm:$0xff]   ;;  %v2865_v56 = vld [vmem:[#allocation8 + $0xc8] ss:$16 sps:$4 sm:$0xff]  }
  0xec   :  { %1367 = vmatpush1.bf16.msra.mxu0 %v2778_v57  ;;  %1490 = vmatpush1.bf16.msra.mxu1 %v2781_v58  ;;  %v2870_v57 = vld [vmem:[#allocation8 + $0xe4] ss:$16 sps:$4 sm:$0xff]   ;;  %v2873_v58 = vld [vmem:[#allocation8 + $0xec] ss:$16 sps:$4 sm:$0xff]  }
  0xed   :  { %1368 = vmatprep.subr.bf16.mxu0 %v2786_v59  ;;  %1491 = vmatprep.subr.bf16.mxu1 %v2789_v60  ;;  %v2868_v59 = vld [vmem:[#allocation8 + $0xe0] ss:$16 sps:$4 sm:$0xff]   ;;  %v2871_v60 = vld [vmem:[#allocation8 + $0xe8] ss:$16 sps:$4 sm:$0xff]  }
  0xf0   :  { %1369 = vmatpush1.bf16.msra.mxu0 %v2784_v61  ;;  %1492 = vmatpush1.bf16.msra.mxu1 %v2787_v62  ;;  %v2876_v61 = vld [vmem:[#allocation8 + $0x104] ss:$16 sps:$4 sm:$0xff]   ;;  %v2879_v62 = vld [vmem:[#allocation8 + $0x10c] ss:$16 sps:$4 sm:$0xff]  }
  0xf1   :  { %1370 = vmatprep.subr.bf16.mxu0 %v2792_v63  ;;  %1493 = vmatprep.subr.bf16.mxu1 %v2795_v0  ;;  %v2874_v63 = vld [vmem:[#allocation8 + $0x100] ss:$16 sps:$4 sm:$0xff]   ;;  %v2877_v0 = vld [vmem:[#allocation8 + $0x108] ss:$16 sps:$4 sm:$0xff]  }
  0xf4   :  { %1371 = vmatpush1.bf16.msra.mxu0 %v2790_v1  ;;  %1494 = vmatpush1.bf16.msra.mxu1 %v2793_v2  ;;  %v2882_v1 = vld [vmem:[#allocation8 + $0x124] ss:$16 sps:$4 sm:$0xff]   ;;  %v2885_v2 = vld [vmem:[#allocation8 + $0x12c] ss:$16 sps:$4 sm:$0xff]  }
  0xf5   :  { %1372 = vmatprep.subr.bf16.mxu0 %v2798_v3  ;;  %1495 = vmatprep.subr.bf16.mxu1 %v2801_v4  ;;  %v2880_v3 = vld [vmem:[#allocation8 + $0x120] ss:$16 sps:$4 sm:$0xff]   ;;  %v2883_v4 = vld [vmem:[#allocation8 + $0x128] ss:$16 sps:$4 sm:$0xff]  }
  0xf8   :  { %1373 = vmatpush1.bf16.msra.mxu0 %v2796_v5  ;;  %1496 = vmatpush1.bf16.msra.mxu1 %v2799_v6  ;;  %v2888_v5 = vld [vmem:[#allocation8 + $0x144] ss:$16 sps:$4 sm:$0xff]   ;;  %v2891_v6 = vld [vmem:[#allocation8 + $0x14c] ss:$16 sps:$4 sm:$0xff]  }
  0xf9   :  { %1374 = vmatprep.subr.bf16.mxu0 %v2804_v7  ;;  %1497 = vmatprep.subr.bf16.mxu1 %v2807_v8  ;;  %v2886_v7 = vld [vmem:[#allocation8 + $0x140] ss:$16 sps:$4 sm:$0xff]   ;;  %v2889_v8 = vld [vmem:[#allocation8 + $0x148] ss:$16 sps:$4 sm:$0xff]  }
  0xfc   :  { %1375 = vmatpush1.bf16.msra.mxu0 %v2802_v10  ;;  %1498 = vmatpush1.bf16.msra.mxu1 %v2805_v11  ;;  %v2894_v10 = vld [vmem:[#allocation8 + $0x164] ss:$16 sps:$4 sm:$0xff]   ;;  %v2897_v11 = vld [vmem:[#allocation8 + $0x16c] ss:$16 sps:$4 sm:$0xff]  }
  0xfd   :  { %1376 = vmatprep.subr.bf16.mxu0 %v2810_v12  ;;  %1499 = vmatprep.subr.bf16.mxu1 %v2813_v13  ;;  %v2892_v12 = vld [vmem:[#allocation8 + $0x160] ss:$16 sps:$4 sm:$0xff]   ;;  %v2895_v13 = vld [vmem:[#allocation8 + $0x168] ss:$16 sps:$4 sm:$0xff]  }
 0x100   :  { %1377 = vmatpush1.bf16.msra.mxu0 %v2808_v14  ;;  %1500 = vmatpush1.bf16.msra.mxu1 %v2811_v15  ;;  %v2900_v14 = vld [vmem:[#allocation8 + $0x184] ss:$16 sps:$4 sm:$0xff]   ;;  %v2903_v15 = vld [vmem:[#allocation8 + $0x18c] ss:$16 sps:$4 sm:$0xff]  }
 0x101   :  { %1378 = vmatprep.subr.bf16.mxu0 %v2816_v16  ;;  %1501 = vmatprep.subr.bf16.mxu1 %v2819_v17  ;;  %v2898_v16 = vld [vmem:[#allocation8 + $0x180] ss:$16 sps:$4 sm:$0xff]   ;;  %v2901_v17 = vld [vmem:[#allocation8 + $0x188] ss:$16 sps:$4 sm:$0xff]  }
 0x104   :  { %1379 = vmatpush1.bf16.msra.mxu0 %v2814_v18  ;;  %1502 = vmatpush1.bf16.msra.mxu1 %v2817_v19  ;;  %v2906_v18 = vld [vmem:[#allocation8 + $0x1a4] ss:$16 sps:$4 sm:$0xff]   ;;  %v2909_v19 = vld [vmem:[#allocation8 + $0x1ac] ss:$16 sps:$4 sm:$0xff]  }
 0x105   :  { %1380 = vmatprep.subr.bf16.mxu0 %v2822_v20  ;;  %1503 = vmatprep.subr.bf16.mxu1 %v2825_v21  ;;  %v2904_v20 = vld [vmem:[#allocation8 + $0x1a0] ss:$16 sps:$4 sm:$0xff]   ;;  %v2907_v21 = vld [vmem:[#allocation8 + $0x1a8] ss:$16 sps:$4 sm:$0xff]  }
 0x108   :  { %1381 = vmatpush1.bf16.msra.mxu0 %v2820_v23  ;;  %1504 = vmatpush1.bf16.msra.mxu1 %v2823_v25  ;;  %v2912_v23 = vld [vmem:[#allocation8 + $0x1c4] ss:$16 sps:$4 sm:$0xff]   ;;  %v2915_v25 = vld [vmem:[#allocation8 + $0x1cc] ss:$16 sps:$4 sm:$0xff]  }
 0x109   :  { %1934 = vmatprep.subr.bf16.mxu0 %v2828_v26  ;;  %1975 = vmatprep.subr.bf16.mxu1 %v2831_v27  ;;  %v2910_v26 = vld [vmem:[#allocation8 + $0x1c0] ss:$16 sps:$4 sm:$0xff]   ;;  %v2913_v27 = vld [vmem:[#allocation8 + $0x1c8] ss:$16 sps:$4 sm:$0xff]  }
 0x10b   :  { %1383 = vmatmul.mubr.bf16.vlgmr.msra.gmra.mrb[0].mxu0 %v114_v29  ;;  %1506 = vmatmul.mubr.bf16.vlgmr.msra.gmra.mrb[0].mxu1 %v114_v29  ;;  %v2921_v29 = vld [vmem:[#allocation8 + $0x1ec] ss:$16 sps:$4 sm:$0xff]  }
 0x10c   :  { %1935 = vmatpush1.bf16.msra.mxu0 %v2826_v30  ;;  %1976 = vmatpush1.bf16.msra.mxu1 %v2829_v9  ;;  %v2916_v30 = vld [vmem:[#allocation8 + $0x1e0] ss:$16 sps:$4 sm:$0xff]   ;;  %v2919_v9 = vld [vmem:[#allocation8 + $0x1e8] ss:$16 sps:$4 sm:$0xff]  }
 0x10d   :  { %1936 = vmatprep.subr.bf16.mxu0 %v2834_v31  ;;  %1977 = vmatprep.subr.bf16.mxu1 %v2837_v32  ;;  %v1526_v31 = vpack.c.bf16 %v3177_v22, %v3177_v22 }
 0x10e   :  { %1966 = vmatprep.mubr.bf16.mxu0 %v1527_v33  ;;  %2007 = vmatprep.mubr.bf16.mxu1 %v1527_v33 }
 0x110   :  { %1937 = vmatpush1.bf16.msra.mxu0 %v2832_v34  ;;  %1978 = vmatpush1.bf16.msra.mxu1 %v2835_v35 }
 0x111   :  { %1938 = vmatprep.subr.bf16.mxu0 %v2840_v36  ;;  %1979 = vmatprep.subr.bf16.mxu1 %v2843_v37 }
 0x114   :  { %1939 = vmatpush1.bf16.msra.mxu0 %v2838_v24  ;;  %1980 = vmatpush1.bf16.msra.mxu1 %v2841_v38 }
 0x115   :  { %1940 = vmatprep.subr.bf16.mxu0 %v2846_v39  ;;  %1981 = vmatprep.subr.bf16.mxu1 %v2849_v40 }
 0x118   :  { %1941 = vmatpush1.bf16.msra.mxu0 %v2844_v41  ;;  %1982 = vmatpush1.bf16.msra.mxu1 %v2847_v42 }
 0x119   :  { %1942 = vmatprep.subr.bf16.mxu0 %v2852_v44  ;;  %1983 = vmatprep.subr.bf16.mxu1 %v2855_v45 }
 0x11c   :  { %1943 = vmatpush1.bf16.msra.mxu0 %v2850_v46  ;;  %1984 = vmatpush1.bf16.msra.mxu1 %v2853_v47 }
 0x11d   :  { %1944 = vmatprep.subr.bf16.mxu0 %v2858_v48  ;;  %1985 = vmatprep.subr.bf16.mxu1 %v2861_v50 }
 0x120   :  { %1945 = vmatpush1.bf16.msra.mxu0 %v2856_v51  ;;  %1986 = vmatpush1.bf16.msra.mxu1 %v2859_v52  ;;  %v1596_v51 = vsub.s32 0, %v3160_v43  ;;  %v1604_v52 = vsub.s32 2, %v3160_v43 }
 0x121   :  { %1946 = vmatprep.subr.bf16.mxu0 %v2864_v53  ;;  %1987 = vmatprep.subr.bf16.mxu1 %v2867_v54  ;;  %v1592_v53 = vld [vmem:[%s3250_s4] sm:$0xf]  ;;  %v1600_v54 = vsub.s32 1, %v3160_v43  ;;  %s3075_s4 = smov [#allocation10]  }
 0x122   :  { %s2228_s20 = sshll.u32 %s3075_s4, 4  ;;  %s2229_s20 = int_to_ptr.vmem [resolvable:$true] %s2228_s20 }
 0x123   :  { %s3014_s21 = scalar_lea.vmem %s2229_s20, 128  ;;  %p3019_p5 = scmp.lt.s32.totalorder %s2229_s20, %s2229_s20 }
 0x124   :  { %1947 = vmatpush1.bf16.msra.mxu0 %v2862_v55  ;;  %1988 = vmatpush1.bf16.msra.mxu1 %v2865_v56  ;;  %v1608_v55 = vsub.s32 3, %v3160_v43  ;;  %v1597_v56 = vrot.slane %v1592_v53, %v1596_v51  ;;  %p3015_p4 = scmp.ne.s32.totalorder %s2229_s20, %s3014_s21  ;;  %p3020_p6 = scmp.lt.s32.totalorder %s3014_s21, %s3014_s21 }
 0x125   :  { %1948 = vmatprep.subr.bf16.mxu0 %v2870_v57  ;;  %1989 = vmatprep.subr.bf16.mxu1 %v2873_v58  ;;  %v1605_v57 = vrot.slane %v1592_v53, %v1604_v52  ;;  %v1601_v58 = vrot.slane %v1592_v53, %v1600_v54 }
 0x126   :  { %p3021_p7 = por %p3020_p6, %p3019_p5 }
 0x128   :  { %1949 = vmatpush1.bf16.msra.mxu0 %v2868_v59  ;;  %1990 = vmatpush1.bf16.msra.mxu1 %v2871_v60  ;;  %v1609_v59 = vrot.slane %v1592_v53, %v1608_v55  ;;  %p3022_p8 = pnand %p3021_p7, %p3015_p4 }
 0x129   :  { %1950 = vmatprep.subr.bf16.mxu0 %v2876_v61  ;;  %1991 = vmatprep.subr.bf16.mxu1 %v2879_v62 }
 0x12c   :  { %1951 = vmatpush1.bf16.msra.mxu0 %v2874_v63  ;;  %1992 = vmatpush1.bf16.msra.mxu1 %v2877_v0 }
 0x12d   :  { %1952 = vmatprep.subr.bf16.mxu0 %v2882_v1  ;;  %1993 = vmatprep.subr.bf16.mxu1 %v2885_v2 }
 0x130   :  { %1953 = vmatpush1.bf16.msra.mxu0 %v2880_v3  ;;  %1994 = vmatpush1.bf16.msra.mxu1 %v2883_v4 }
 0x131   :  { %1954 = vmatprep.subr.bf16.mxu0 %v2888_v5  ;;  %1995 = vmatprep.subr.bf16.mxu1 %v2891_v6 }
 0x134   :  { %1955 = vmatpush1.bf16.msra.mxu0 %v2886_v7  ;;  %1996 = vmatpush1.bf16.msra.mxu1 %v2889_v8 }
 0x135   :  { %1956 = vmatprep.subr.bf16.mxu0 %v2894_v10  ;;  %1997 = vmatprep.subr.bf16.mxu1 %v2897_v11 }
 0x138   :  { %1957 = vmatpush1.bf16.msra.mxu0 %v2892_v12  ;;  %1998 = vmatpush1.bf16.msra.mxu1 %v2895_v13 }
 0x139   :  { %1958 = vmatprep.subr.bf16.mxu0 %v2900_v14  ;;  %1999 = vmatprep.subr.bf16.mxu1 %v2903_v15 }
 0x13c   :  { %1959 = vmatpush1.bf16.msra.mxu0 %v2898_v16  ;;  %2000 = vmatpush1.bf16.msra.mxu1 %v2901_v17 }
 0x13d   :  { %1960 = vmatprep.subr.bf16.mxu0 %v2906_v18  ;;  %2001 = vmatprep.subr.bf16.mxu1 %v2909_v19 }
 0x140   :  { %1961 = vmatpush1.bf16.msra.mxu0 %v2904_v20  ;;  %2002 = vmatpush1.bf16.msra.mxu1 %v2907_v21 }
 0x141   :  { %1962 = vmatprep.subr.bf16.mxu0 %v2912_v23  ;;  %2003 = vmatprep.subr.bf16.mxu1 %v2915_v25 }
 0x144   :  { %1963 = vmatpush1.bf16.msra.mxu0 %v2910_v26  ;;  %2004 = vmatpush1.bf16.msra.mxu1 %v2913_v27 }
 0x145   :  { %1964 = vmatprep.subr.bf16.mxu0 %v2918_v28  ;;  %2005 = vmatprep.subr.bf16.mxu1 %v2921_v29 }
 0x148   :  { %1965 = vmatpush1.bf16.msra.mxu0 %v2916_v30  ;;  %2006 = vmatpush1.bf16.msra.mxu1 %v2919_v9 }
 0x14b   :  { %1967 = vmatmul.mubr.bf16.vlgmr.msra.gmra.mrb[4].mxu0 %v1526_v31  ;;  %2008 = vmatmul.mubr.bf16.vlgmr.msra.gmra.mrb[4].mxu1 %v1526_v31 }
 0x1de   :  { %v3185_v32 = vpop.f32.mrb[0].mxu0  ;;  %v3187_v33 = vpop.f32.mrb[0].mxu1 }
 0x1df   :  { %v2016_v34 = vmul.f32 %v3185_v32, %v3185_v32  ;;  %v3191_v35 = vpop.f32.mrb[1].mxu0  ;;  %v3193_v36 = vpop.f32.mrb[1].mxu1  ;;  %v2018_v37 = vmul.f32 %v3187_v33, %v3187_v33 }
 0x1e0   :  { %v2017_v22 = vmul.f32 %v3191_v35, %v3191_v35  ;;  %v1388_v24 = vpop.f32.mrb[2].mxu0  ;;  %v1511_v38 = vpop.f32.mrb[2].mxu1  ;;  %v2019_v44 = vmul.f32 %v3193_v36, %v3193_v36 }
 0x1e1   :  { %v2021_v39 = vsel %vm2020_vm0, %v2016_v34, 0.0  ;;  %v1389_v40 = vpop.f32.mrb[3].mxu0  ;;  %v1512_v41 = vpop.f32.mrb[3].mxu1  ;;  %v2024_v46 = vsel %vm2020_vm0, %v2018_v37, 0.0 }
 0x1e2   :  { %v2022_v42 = vsel %vm2020_vm0, %v2017_v22, 0.0  ;;  %v2026_v48 = vsel %vm2020_vm0, %v2019_v44, 0.0 }
 0x1e3   :  { %v2023_v45 = vadd.f32 %v2022_v42, %v2021_v39 }
 0x1e5   :  { %v2025_v47 = vadd.f32 %v2024_v46, %v2023_v45 }
 0x1e7   :  { %v2027_v50 = vadd.f32 %v2026_v48, %v2025_v47 }
 0x21e   :  { %v1968_v60 = vpop.f32.mrb[4].mxu0  ;;  %v2009_v61 = vpop.f32.mrb[4].mxu1 }
 0x21f   :  { %v1969_v62 = vadd.f32 %v1968_v60, %v1597_v56  ;;  %v2010_v63 = vadd.f32 %v2009_v61, %v1605_v57  ;;  %v1970_v0 = vpop.f32.mrb[5].mxu0  ;;  %v2011_v1 = vpop.f32.mrb[5].mxu1 }
 0x220   :  { %v1971_v2 = vadd.f32 %v1970_v0, %v1601_v58  ;;  %v2012_v3 = vadd.f32 %v2011_v1, %v1609_v59  ;;  %v1972_v4 = vpop.f32.mrb[6].mxu0  ;;  %v2013_v5 = vpop.f32.mrb[6].mxu1 }
 0x221   :  { %v2036_v6 = vmul.f32 %v1969_v62, %v1969_v62  ;;  %v2038_v7 = vmul.f32 %v2010_v63, %v2010_v63  ;;  %v1973_v8 = vpop.f32.mrb[7].mxu0  ;;  %v2014_v10 = vpop.f32.mrb[7].mxu1 }
 0x222   :  { %v2037_v11 = vmul.f32 %v1971_v2, %v1971_v2  ;;  %v2039_v13 = vmul.f32 %v2012_v3, %v2012_v3 }
 0x223   :  { %v2040_v43 = vsel %vm2020_vm0, %v2036_v6, 0.0  ;;  %v2043_v14 = vsel %vm2020_vm0, %v2038_v7, 0.0 }
 0x224   :  { %v2041_v12 = vsel %vm2020_vm0, %v2037_v11, 0.0  ;;  %v2045_v17 = vsel %vm2020_vm0, %v2039_v13, 0.0 }
 0x225   :  { %v2042_v15 = vadd.f32 %v2041_v12, %v2040_v43 }
 0x227   :  { %v2044_v16 = vadd.f32 %v2043_v14, %v2042_v15 }
 0x229   :  { %v2046_v18 = vadd.f32 %v2045_v17, %v2044_v16 }
 0x22b   :  { %2047 = vadd.xlane.f32.xlu0 %v2046_v18 }
 0x22f   :  { %2028 = vadd.xlane.f32.xlu0 %v2027_v50 }
 0x2b8   :  { %v2048_v19 = vpop.xlane.xlu0 %2047 }
 0x2b9   :  { %v2049_v20 = vadd.f32 1e-12, %v2048_v19 }
 0x2bb   :  { %2922 = vrsqrt.f32 %v2049_v20 }
 0x2bc   :  { %v2029_v21 = vpop.xlane.xlu0 %2028 }
 0x2bd   :  { %v2030_v23 = vadd.f32 1e-12, %v2029_v21 }
 0x2bf   :  { %2924 = vrsqrt.f32 %v2030_v23 }
 0x2c5   :  { %v2923_v25 = vpop.eup %2922 }
 0x2c6   :  { %v2051_v26 = vmul.f32 %v2923_v25, %v1969_v62  ;;  %v2052_v27 = vmul.f32 %v2923_v25, %v1971_v2  ;;  %v2053_v28 = vmul.f32 %v2923_v25, %v2010_v63  ;;  %v2054_v29 = vmul.f32 %v2923_v25, %v2012_v3 }
 0x2c8   :  { %v2059_v30 = vcombine.low %v2051_v26, %v2052_v27  ;;  %2078 = vmatprep.subr.mxu1 %v2052_v27  ;;  %v2060_v9 = vcombine.low %v2053_v28, %v2054_v29  ;;  %2148 = vmatprep.subr.mxu0 %v2054_v29 }
 0x2c9   :  { %v2925_v31 = vpop.eup %2924  ;;  %2079 = vmatpush1.xpose.msra.mxu1 %v2051_v26  ;;  %2149 = vmatpush1.xpose.msra.mxu0 %v2053_v28 }
 0x2ca   :  { %v2033_v34 = vmul.f32 %v2925_v31, %v3191_v35  ;;  %v2035_v37 = vmul.f32 %v2925_v31, %v3193_v36  ;;  %v2032_v22 = vmul.f32 %v2925_v31, %v3185_v32  ;;  %v2034_v24 = vmul.f32 %v2925_v31, %v3187_v33 }
 0x2cb   :  { %v2067_v38 = vrot.slane %v2059_v30, %v3163_v49  ;;  %v2074_v39 = vrot.slane %v2060_v9, %v3163_v49 }
 0x2cc   :  { %2142 = vmatprep.mubr.f32.mxu1 %v2033_v34  ;;  %2212 = vmatprep.mubr.f32.mxu0 %v2035_v37 }
 0x2cd   :  { %2143 = vmatmul.mubr.f32.vlgmr.msra.gmra.mrb[8].mxu1 %v2032_v22  ;;  %2213 = vmatmul.mubr.f32.vlgmr.msra.gmra.mrb[8].mxu0 %v2034_v24  ;;  %v2075_v40 = vcombine.low %v2067_v38, %v2074_v39 }
 0x2cf   :  { %2077 = vst [vmem:[#allocation10] sm:$0xff] %v2075_v40 }
 0x2d0   :  { %3025 = shalt.err (!%p3022_p8)
}
 0x2d1   :  { %s3026_s25 = scalar_lea.hbm %s3251_s5, 128 }
 0x2d2   :  { %p3027_p9 = scmp.ne.s32.totalorder %s3251_s5, %s3026_s25  ;;  %p3030_p10 = scmp.lt.u32.totalorder %s3026_s25, %s3251_s5 }
 0x2d4   :  { %p3032_p11 = pnand %p3030_p10, %p3027_p9 }
 0x2d6   :  { %3035 = shalt.err (!%p3032_p11)
}
 0x2d7   :  { %2231 = dma.vmem_to_hbm [thread:$0]  %s2229_s20, 128, %s3251_s5, [#allocation4]   ;;  %vm2220_vm1 = vcmask 8192  }
 0x2d8   :  { %s3076_s24 = smov [#allocation11]  }
 0x2d9   :  { %s2238_s7 = sshll.u32 %s3076_s24, 4  ;;  %s2239_s7 = int_to_ptr.vmem [resolvable:$true] %s2238_s7 }
 0x2da   :  { %s3036_s8 = scalar_lea.vmem %s2239_s7, 16  ;;  %s3040_s9 = scalar_lea.vmem %s2239_s7, 32 }
 0x2db   :  { %p3037_p12 = scmp.ne.s32.totalorder %s2239_s7, %s3036_s8  ;;  %p3041_p13 = scmp.lt.s32.totalorder %s2239_s7, %s2239_s7 }
 0x2dc   :  { %p3042_p0 = scmp.lt.s32.totalorder %s3040_s9, %s3036_s8 }
 0x2de   :  { %p3043_p1 = por %p3042_p0, %p3041_p13 }
 0x2e0   :  { %p3044_p2 = pnand %p3043_p1, %p3037_p12 }
 0x3a0   :  { %v2144_v49 = vpop.f32.mrb[8].mxu1  ;;  %v2214_v32 = vpop.f32.mrb[8].mxu0 }
 0x3a1   :  { %v2215_v33 = vadd.f32 %v2214_v32, %v2144_v49  ;;  %v2146_v35 = vpop.f32.mrb[9].mxu1  ;;  %v2216_v36 = vpop.f32.mrb[9].mxu0 }
 0x3a3   :  { %v2218_v41 = vmul.f32 1.0725082, %v2215_v33 }
 0x3a5   :  { %v2219_v42 = vsub.f32 1.0, %v2218_v41 }
 0x3a7   :  { %2221 = vst.msk [vmem:[#allocation11] sm:$0x1] %vm2220_vm1, %v2219_v42 }
 0x3a8   :  { %3047 = shalt.err (!%p3044_p2)
}
 0x3a9   :  { %s3048_s11 = scalar_lea.hbm %s3252_s6, 16 }
 0x3aa   :  { %p3049_p3 = scmp.ne.s32.totalorder %s3252_s6, %s3048_s11  ;;  %p3052_p4 = scmp.lt.u32.totalorder %s3048_s11, %s3252_s6 }
 0x3ac   :  { %p3054_p5 = pnand %p3052_p4, %p3049_p3 }
 0x3ae   :  { %3057 = shalt.err (!%p3054_p5)
}
 0x3af   :  { %2241 = dma.vmem_to_hbm [thread:$0]  %s2239_s7, 16, %s3252_s6, [#allocation12]  }
 0x3b0   :  { %3064 = dma.done.wait [#allocation4], 128  }
 0x3b1   :  { %3065 = vsyncadd [#allocation4], 4294967168 }
 0x3b2   :  { %3066 = dma.done.wait [#allocation12], 16  }
 0x3b3   :  { %3067 = vsyncadd [#allocation12], 4294967280 }
 0x3b4   :  { %2248 = vsyncpa [#allocation3], 1 }
 0x3b5   :  { %2249 = vsyncpa [#allocation6], 1 }
 0x3b6   :  { %2250 = vsyncpa [#allocation9], 1 }
 0x3b7   :  { %2251 = vsyncpa [#allocation4], 1 }
 0x3b8   :  { %2252 = vsyncpa [#allocation12], 1 }

</bundles_post_ra>
